<compile_context>
chip_gen: v7x
topology: tpu7x:2x2x1
jax: 0.10.0
libtpu: 0.0.40
codegen_flags: <defaults>
</compile_context>

<pallas_src>
import functools

import jax
import jax.numpy as jnp
from jax import lax
from jax.experimental import pallas as pl
from jax.experimental.pallas import tpu as pltpu

SOBEL_X = ((-1.0, 0.0, 1.0),
           (-2.0, 0.0, 2.0),
           (-1.0, 0.0, 1.0))
SOBEL_Y = ((-1.0, -2.0, -1.0),
           ( 0.0,  0.0,  0.0),
           ( 1.0,  2.0,  1.0))


def _cdiv(a, b):
    return -(-a // b)


def _make_kernel(*, C, H, W, TH, BT, has_halo):
    """Builds the kernel body as a closure over the static tile sizes."""
    mask_rows = (H % TH) != 0  # ragged last row-tile -> zero rows past the image

    def csum(x):  # (BT, C, R, W) -> (BT, R, W) float32 channel sum
        return jnp.sum(x.astype(jnp.float32), axis=1)

    def stencil(top, mid, bot, gx_ref, gy_ref):
        # top/bot: (BT, 1, W) neighbor rows (already zeroed at the image border);
        # mid: (BT, TH, W) channel-summed tile.
        xv = jnp.concatenate([top, mid, bot], axis=1)            # (BT, TH+2, W)
        zc = jnp.zeros((BT, TH + 2, 1), jnp.float32)
        xs = jnp.concatenate([zc, xv, zc], axis=2)               # (BT, TH+2, W+2)
        # Horizontal pass of the separable sobel.
        s = xs[:, :, 0:W] + 2.0 * xs[:, :, 1:W + 1] + xs[:, :, 2:W + 2]
        d = xs[:, :, 2:W + 2] - xs[:, :, 0:W]
        # Vertical pass.
        gx = d[:, 0:TH, :] + 2.0 * d[:, 1:TH + 1, :] + d[:, 2:TH + 2, :]
        gy = s[:, 2:TH + 2, :] - s[:, 0:TH, :]
        gx_ref[:, 0, :, :] = gx
        gy_ref[:, 0, :, :] = gy

    if has_halo:
        def kernel(top_ref, mid_ref, bot_ref, gx_ref, gy_ref):
            h = pl.program_id(1)
            mid = csum(mid_ref[...])                              # (BT, TH, W)
            if mask_rows:
                rows = h * TH + lax.broadcasted_iota(jnp.int32, (BT, TH, W), 1)
                mid = jnp.where(rows < H, mid, 0.0)
            # Row h*TH-1 sits at sublane 7 of its 8-row halo block, row (h+1)*TH
            # at sublane 0 of its block (TH is a multiple of 8 when tiling).
            top = csum(top_ref[:, :, 7:8, :])                     # (BT, 1, W)
            bot = csum(bot_ref[:, :, 0:1, :])
            top = top * (h > 0).astype(jnp.float32)               # zero pad above row 0
            bot = bot * ((h + 1) * TH < H).astype(jnp.float32)    # zero pad below row H-1
            stencil(top, mid, bot, gx_ref, gy_ref)
        return kernel

    def kernel(mid_ref, gx_ref, gy_ref):
        mid = csum(mid_ref[...])
        z = jnp.zeros((BT, 1, W), jnp.float32)
        stencil(z, mid, z, gx_ref, gy_ref)
    return kernel


def _choose_tiles(N, C, H, W, tile_h, batch_tile):
    if tile_h is None:
        # ~4 MiB main input block => double-buffered in/out + temporaries stays
        # comfortably under the 40 MiB VMEM limit we request (safe on v7x's 64 MiB).
        budget = 4 * 1024 * 1024
        tile_h = min(512, max(8, budget // max(1, C * W * 4)))
    th = H if tile_h >= H else max(8, (tile_h // 8) * 8)   # multiple of 8 when tiling
    if th >= H:
        th = H
    n_h = _cdiv(H, th)
    if batch_tile is None:
        per = C * th * W * 4
        batch_tile = min(8, max(1, (2 * 1024 * 1024) // max(1, per)))
    bt = max(1, min(batch_tile, N))
    return th, bt, n_h


@functools.partial(jax.jit, static_argnames=("tile_h", "batch_tile"))
def sobel_filter(image, tile_h=None, batch_tile=None):
    """image: (N, 3, H, W)  ->  (grad_x, grad_y), each (N, 1, H, W) float32."""
    N, C, H, W = image.shape
    TH, BT, n_h = _choose_tiles(N, C, H, W, tile_h, batch_tile)
    has_halo = n_h > 1

    kernel = _make_kernel(C=C, H=H, W=W, TH=TH, BT=BT, has_halo=has_halo)

    mid_spec = pl.BlockSpec((BT, C, TH, W), lambda b, h: (b, 0, h, 0))
    out_spec = pl.BlockSpec((BT, 1, TH, W), lambda b, h: (b, 0, h, 0))
    if has_halo:
        # +/-1-row halos, fetched as the 8-row block containing the needed row
        # (block index clamped to stay in bounds; zeroed in-kernel at the border).
        top_spec = pl.BlockSpec(
            (BT, C, 8, W),
            lambda b, h: (b, 0, jnp.maximum(h * TH - 1, 0) // 8, 0))
        bot_spec = pl.BlockSpec(
            (BT, C, 8, W),
            lambda b, h: (b, 0, jnp.minimum((h + 1) * TH, H - 1) // 8, 0))
        in_specs = [top_spec, mid_spec, bot_spec]
        args = (image, image, image)
    else:
        in_specs = [mid_spec]
        args = (image,)

    out_shape = (jax.ShapeDtypeStruct((N, 1, H, W), jnp.float32),
                 jax.ShapeDtypeStruct((N, 1, H, W), jnp.float32))

    # Clearly HBM-bound: 3 input planes read + 2 output planes written per image.
    cost = pl.CostEstimate(flops=10 * N * H * W,
                           transcendentals=0,
                           bytes_accessed=(C + 2) * N * H * W * 4)

    gx, gy = pl.pallas_call(
        kernel,
        out_shape=out_shape,
        grid_spec=pltpu.PrefetchScalarGridSpec(
            num_scalar_prefetch=0,
            grid=(_cdiv(N, BT), n_h),
            in_specs=in_specs,
            out_specs=[out_spec, out_spec],
        ),
        compiler_params=pltpu.CompilerParams(
            dimension_semantics=("parallel", "parallel"),
            vmem_limit_bytes=40 * 1024 * 1024),
        cost_estimate=cost,
    )(*args)
    return gx, gy


def _reference(image):
    # Pure-JAX reference using the exact weights the PyTorch module ends up with:
    # weight shape (1, 3, 3, 3) OIHW (sobel kernel broadcast over in-channels).
    kx = jnp.broadcast_to(jnp.array(SOBEL_X, jnp.float32)[None, None], (1, 3, 3, 3))
    ky = jnp.broadcast_to(jnp.array(SOBEL_Y, jnp.float32)[None, None], (1, 3, 3, 3))
    dn = lax.conv_dimension_numbers(image.shape, kx.shape, ("NCHW", "OIHW", "NCHW"))
    gx = lax.conv_general_dilated(image, kx, (1, 1), ((1, 1), (1, 1)),
                                  dimension_numbers=dn)
    gy = lax.conv_general_dilated(image, ky, (1, 1), ((1, 1), (1, 1)),
                                  dimension_numbers=dn)
    return gx, gy


if __name__ == "__main__":
    key = jax.random.PRNGKey(0)

    # Primary small test (module requires 3 input channels): single row tile,
    # both batch elements packed into one grid step.
    x = jax.random.normal(key, (2, 3, 16, 16), dtype=jnp.float32)
    gx, gy = sobel_filter(x)
    jax.block_until_ready((gx, gy))
    rgx, rgy = _reference(x)
    assert gx.shape == (2, 1, 16, 16) and gy.shape == (2, 1, 16, 16)
    assert jnp.allclose(gx, rgx, atol=1e-4, rtol=1e-4)
    assert jnp.allclose(gy, rgy, atol=1e-4, rtol=1e-4)

    # Also exercise the tiled (halo) path: ragged row tiles (40 = 16+16+8),
    # ragged batch tile (3 batches, 2 per step), lane-dense W=128.
    x2 = jax.random.normal(jax.random.PRNGKey(0), (3, 3, 40, 128), dtype=jnp.float32)
    gx2, gy2 = sobel_filter(x2, tile_h=16, batch_tile=2)
    jax.block_until_ready((gx2, gy2))
    rgx2, rgy2 = _reference(x2)
    assert jnp.allclose(gx2, rgx2, atol=1e-4, rtol=1e-4)
    assert jnp.allclose(gy2, rgy2, atol=1e-4, rtol=1e-4)

    print("KERNEL_OK")
</pallas_src>

<mosaic_0001>
module attributes {stable_mosaic.version = 11 : i64} {
  func.func @kernel(%arg0: i32, %arg1: i32, %arg2: memref<2x3x16x16xf32, #tpu.memory_space<vmem>>, %arg3: memref<2x1x16x16xf32, #tpu.memory_space<vmem>>, %arg4: memref<2x1x16x16xf32, #tpu.memory_space<vmem>>) attributes {dimension_semantics = [#tpu.dimension_semantics<parallel>, #tpu.dimension_semantics<parallel>], iteration_bounds = array<i64: 1, 1>, scalar_prefetch = 0 : i64, scratch_operands = 0 : i64, tpu.core_type = #tpu.core_type<tc>, window_params = [{transform_indices = @transform_0, window_bounds = array<i64: 2, 3, 16, 16>}, {transform_indices = @transform_1, window_bounds = array<i64: 2, 1, 16, 16>}, {transform_indices = @transform_2, window_bounds = array<i64: 2, 1, 16, 16>}]} {
    %c0 = arith.constant 0 : index
    %c0_0 = arith.constant 0 : index
    %c0_1 = arith.constant 0 : index
    %c0_2 = arith.constant 0 : index
    %0 = vector.load %arg2[%c0, %c0_0, %c0_1, %c0_2] : memref<2x3x16x16xf32, #tpu.memory_space<vmem>>, vector<2x3x16x16xf32>
    %cst = arith.constant dense<0.000000e+00> : vector<2x16x16xf32>
    %1 = vector.multi_reduction <add>, %0, %cst [1] : vector<2x3x16x16xf32> to vector<2x16x16xf32>
    %cst_3 = arith.constant 0.000000e+00 : f32
    %2 = vector.broadcast %cst_3 : f32 to vector<2x1x16xf32>
    %3 = tpu.concatenate %2, %1, %2 in 1 : vector<2x1x16xf32>, vector<2x16x16xf32>, vector<2x1x16xf32> -> vector<2x18x16xf32>
    %cst_4 = arith.constant 0.000000e+00 : f32
    %4 = vector.broadcast %cst_4 : f32 to vector<2x18x1xf32>
    %5 = tpu.concatenate %4, %3, %4 in 2 : vector<2x18x1xf32>, vector<2x18x16xf32>, vector<2x18x1xf32> -> vector<2x18x18xf32>
    %6 = vector.extract_strided_slice %5 {offsets = [0, 0, 0], sizes = [2, 18, 16], strides = [1, 1, 1]} : vector<2x18x18xf32> to vector<2x18x16xf32>
    %7 = vector.extract_strided_slice %5 {offsets = [0, 0, 1], sizes = [2, 18, 16], strides = [1, 1, 1]} : vector<2x18x18xf32> to vector<2x18x16xf32>
    %cst_5 = arith.constant 2.000000e+00 : f32
    %8 = vector.broadcast %cst_5 : f32 to vector<2x18x16xf32>
    %9 = arith.mulf %8, %7 : vector<2x18x16xf32>
    %10 = arith.addf %6, %9 : vector<2x18x16xf32>
    %11 = vector.extract_strided_slice %5 {offsets = [0, 0, 2], sizes = [2, 18, 16], strides = [1, 1, 1]} : vector<2x18x18xf32> to vector<2x18x16xf32>
    %12 = arith.addf %10, %11 : vector<2x18x16xf32>
    %13 = vector.extract_strided_slice %5 {offsets = [0, 0, 2], sizes = [2, 18, 16], strides = [1, 1, 1]} : vector<2x18x18xf32> to vector<2x18x16xf32>
    %14 = vector.extract_strided_slice %5 {offsets = [0, 0, 0], sizes = [2, 18, 16], strides = [1, 1, 1]} : vector<2x18x18xf32> to vector<2x18x16xf32>
    %15 = arith.subf %13, %14 : vector<2x18x16xf32>
    %16 = vector.extract_strided_slice %15 {offsets = [0, 0, 0], sizes = [2, 16, 16], strides = [1, 1, 1]} : vector<2x18x16xf32> to vector<2x16x16xf32>
    %17 = vector.extract_strided_slice %15 {offsets = [0, 1, 0], sizes = [2, 16, 16], strides = [1, 1, 1]} : vector<2x18x16xf32> to vector<2x16x16xf32>
    %cst_6 = arith.constant 2.000000e+00 : f32
    %18 = vector.broadcast %cst_6 : f32 to vector<2x16x16xf32>
    %19 = arith.mulf %18, %17 : vector<2x16x16xf32>
    %20 = arith.addf %16, %19 : vector<2x16x16xf32>
    %21 = vector.extract_strided_slice %15 {offsets = [0, 2, 0], sizes = [2, 16, 16], strides = [1, 1, 1]} : vector<2x18x16xf32> to vector<2x16x16xf32>
    %22 = arith.addf %20, %21 : vector<2x16x16xf32>
    %23 = vector.extract_strided_slice %12 {offsets = [0, 2, 0], sizes = [2, 16, 16], strides = [1, 1, 1]} : vector<2x18x16xf32> to vector<2x16x16xf32>
    %24 = vector.extract_strided_slice %12 {offsets = [0, 0, 0], sizes = [2, 16, 16], strides = [1, 1, 1]} : vector<2x18x16xf32> to vector<2x16x16xf32>
    %25 = arith.subf %23, %24 : vector<2x16x16xf32>
    %c0_7 = arith.constant 0 : index
    %c0_8 = arith.constant 0 : index
    %c0_9 = arith.constant 0 : index
    %c0_10 = arith.constant 0 : index
    %26 = vector.load %arg3[%c0_7, %c0_8, %c0_9, %c0_10] : memref<2x1x16x16xf32, #tpu.memory_space<vmem>>, vector<2x1x16x16xf32>
    %27 = vector.shape_cast %26 : vector<2x1x16x16xf32> to vector<2x16x16xf32>
    %28 = vector.shape_cast %22 : vector<2x16x16xf32> to vector<2x1x16x16xf32>
    tpu.vector_store %arg3[%c0_7, %c0_8, %c0_9, %c0_10], %28 {strides = array<i32>} : memref<2x1x16x16xf32, #tpu.memory_space<vmem>>, vector<2x1x16x16xf32>,
    %c0_11 = arith.constant 0 : index
    %c0_12 = arith.constant 0 : index
    %c0_13 = arith.constant 0 : index
    %c0_14 = arith.constant 0 : index
    %29 = vector.load %arg4[%c0_11, %c0_12, %c0_13, %c0_14] : memref<2x1x16x16xf32, #tpu.memory_space<vmem>>, vector<2x1x16x16xf32>
    %30 = vector.shape_cast %29 : vector<2x1x16x16xf32> to vector<2x16x16xf32>
    %31 = vector.shape_cast %25 : vector<2x16x16xf32> to vector<2x1x16x16xf32>
    tpu.vector_store %arg4[%c0_11, %c0_12, %c0_13, %c0_14], %31 {strides = array<i32>} : memref<2x1x16x16xf32, #tpu.memory_space<vmem>>, vector<2x1x16x16xf32>,
    return
  }
  func.func @transform_0(%arg0: i32, %arg1: i32) -> (i32, i32, i32, i32) {
    %c0_i32 = arith.constant 0 : i32
    %c0_i32_0 = arith.constant 0 : i32
    %c0_i32_1 = arith.constant 0 : i32
    return %arg0, %c0_i32, %arg1, %c0_i32_0 : i32, i32, i32, i32
  }
  func.func @transform_1(%arg0: i32, %arg1: i32) -> (i32, i32, i32, i32) {
    %c0_i32 = arith.constant 0 : i32
    %c0_i32_0 = arith.constant 0 : i32
    %c0_i32_1 = arith.constant 0 : i32
    return %arg0, %c0_i32, %arg1, %c0_i32_0 : i32, i32, i32, i32
  }
  func.func @transform_2(%arg0: i32, %arg1: i32) -> (i32, i32, i32, i32) {
    %c0_i32 = arith.constant 0 : i32
    %c0_i32_0 = arith.constant 0 : i32
    %c0_i32_1 = arith.constant 0 : i32
    return %arg0, %c0_i32, %arg1, %c0_i32_0 : i32, i32, i32, i32
  }
}

</mosaic_0001>

<bundles_post_ra>
// kernel: sobel_filter.1
= control target key start
LH: loop header
LB: loop body
LE: loop exit
PB: predicated region body
PF: predicated region fallthrough
CT: control target
= control target key end

     0   :  { %8 = vsyncpa [#allocation3], 0  ;;  %s596_s0 = inlined_call_operand.hbm [shape: f32[2,3,16,16], index: 0, kind: input, shape index: {}]   ;;  %s597_s1 = inlined_call_operand.hbm [shape: f32[2,1,16,16], index: 1, kind: output, shape index: {0}]   ;;  %s598_s2 = inlined_call_operand.hbm [shape: f32[2,1,16,16], index: 2, kind: output, shape index: {1}]  }
   0x1   :  { %9 = vsyncpa [#allocation4], 0 }
   0x2   :  { %10 = vsyncpa [#allocation7], 0  ;;  %s425_s9 = smov [#allocation2]   ;;  %s353_s13 = scalar_lea.hbm %s596_s0, 1536 }
   0x3   :  { %s16_s10 = sshll.u32 %s425_s9, 4  ;;  %p354_p0 = scmp.ne.s32.totalorder %s596_s0, %s353_s13  ;;  %s17_s10 = int_to_ptr.vmem [resolvable:$true] %s16_s10 }
   0x4   :  { %p357_p1 = scmp.lt.u32.totalorder %s353_s13, %s596_s0 }
   0x6   :  { %p359_p2 = pnand %p357_p1, %p354_p0 }
   0x8   :  { %362 = shalt.err (!%p359_p2)
}
   0x9   :  { %s363_s18 = scalar_lea.vmem %s17_s10, 1536  ;;  %p368_p4 = scmp.lt.s32.totalorder %s17_s10, %s17_s10 }
   0xa   :  { %p364_p3 = scmp.ne.s32.totalorder %s17_s10, %s363_s18  ;;  %p369_p5 = scmp.lt.s32.totalorder %s363_s18, %s363_s18 }
   0xc   :  { %p370_p6 = por %p369_p5, %p368_p4 }
   0xe   :  { %p371_p7 = pnand %p370_p6, %p364_p3 }
  0x10   :  { %374 = shalt.err (!%p371_p7)
}
  0x11   :  { %s426_s19 = smov 128   ;;  %s427_s20 = smov 8  }
  0x12   :  { %22 = dma.hbm_to_vmem [thread:$0]  %s596_s0, 1536, %s17_s10, [#allocation3], %s426_s19, %s426_s19, %s427_s20  }
  0x13   :  { %419 = dma.done.wait [#allocation3], 1536  }
  0x14   :  { %420 = vsyncadd [#allocation3], 4294965760  ;;  %vm38_vm0 = vcmask 130048   ;;  %v26_v0 = vld [vmem:[#allocation2] sm:$0xff]  ;;  %v28_v1 = vld [vmem:[#allocation2 + $0x10] sm:$0xff]  ;;  %vm63_vm1 = vcmask 1040384  }
  0x15   :  { %v30_v2 = vld [vmem:[#allocation2 + $0x20] sm:$0xff]  ;;  %v39_v3 = vsel %vm38_vm0, %v26_v0, 0.0  ;;  %v40_v4 = vsel %vm38_vm0, %v28_v1, 0.0  ;;  %v27_v6 = vld [vmem:[#allocation2 + $0x8] sm:$0xff]  ;;  %v29_v7 = vld [vmem:[#allocation2 + $0x18] sm:$0xff]  ;;  %s428_s0 = smov 1  }
  0x16   :  { %v42_v5 = vsel %vm38_vm0, %v30_v2, 0.0  ;;  %v31_v8 = vld [vmem:[#allocation2 + $0x28] sm:$0xff]  ;;  %v41_v9 = vadd.f32 %v40_v4, %v39_v3  ;;  %v44_v10 = vsel %vm38_vm0, %v27_v6, 0.0  ;;  %v45_v11 = vsel %vm38_vm0, %v29_v7, 0.0  ;;  %v32_v13 = vld [vmem:[#allocation2 + $0x30] sm:$0xff]  ;;  %v34_v14 = vld [vmem:[#allocation2 + $0x40] sm:$0xff] }
  0x17   :  { %v47_v12 = vsel %vm38_vm0, %v31_v8, 0.0  ;;  %v36_v15 = vld [vmem:[#allocation2 + $0x50] sm:$0xff]  ;;  %v46_v16 = vadd.f32 %v45_v11, %v44_v10  ;;  %v49_v17 = vsel %vm38_vm0, %v32_v13, 0.0  ;;  %v50_v18 = vsel %vm38_vm0, %v34_v14, 0.0  ;;  %v33_v20 = vld [vmem:[#allocation2 + $0x38] sm:$0xff]  ;;  %v35_v21 = vld [vmem:[#allocation2 + $0x48] sm:$0xff] }
  0x18   :  { %v52_v19 = vsel %vm38_vm0, %v36_v15, 0.0  ;;  %v37_v22 = vld [vmem:[#allocation2 + $0x58] sm:$0xff]  ;;  %v43_v23 = vadd.f32 %v42_v5, %v41_v9  ;;  %v51_v24 = vadd.f32 %v50_v18, %v49_v17  ;;  %v54_v25 = vsel %vm38_vm0, %v33_v20, 0.0  ;;  %s429_s23 = smov 2   ;;  %s430_s24 = smov 126  }
  0x19   :  { %v55_v26 = vsel %vm38_vm0, %v35_v21, 0.0  ;;  %v48_v27 = vadd.f32 %v47_v12, %v46_v16  ;;  %v57_v29 = vsel %vm38_vm0, %v37_v22, 0.0  ;;  %vm100_vm2 = vcmask 7168   ;;  %s431_s25 = smov 127   ;;  %s432_s26 = smov [#allocation6]  }
  0x1a   :  { %v56_v28 = vadd.f32 %v55_v26, %v54_v25  ;;  %v64_v30 = vrot.slane %v43_v23, 7  ;;  %v53_v31 = vadd.f32 %v52_v19, %v51_v24  ;;  %vm107_vm3 = vcmask 138240   ;;  %s328_s27 = sshll.u32 %s432_s26, 4  ;;  %s329_s27 = int_to_ptr.vmem [resolvable:$true] %s328_s27 }
  0x1b   :  { %v65_v32 = vrot.slane %v48_v27, 7  ;;  %vm216_vm4 = vcmask 1046528   ;;  %vm241_vm5 = vcmask 1045504   ;;  %vm303_vm6 = vcmask 130050   ;;  %s375_s28 = scalar_lea.vmem %s329_s27, 512  ;;  %p380_p9 = scmp.lt.s32.totalorder %s329_s27, %s329_s27 }
  0x1c   :  { %v58_v33 = vadd.f32 %v57_v29, %v56_v28  ;;  %v74_v34 = vsel %vm63_vm1, 0.0, %v64_v30  ;;  %v67_v35 = vrot.slane %v53_v31, 7  ;;  %vm264_vm7 = vcmask 1041408   ;;  %p376_p8 = scmp.ne.s32.totalorder %s329_s27, %s375_s28  ;;  %p381_p10 = scmp.lt.s32.totalorder %s375_s28, %s375_s28 }
  0x1d   :  { %82 = vrot.lane.b32.xlu0 %v74_v34, %s428_s0  ;;  %v76_v36 = vsel %vm63_vm1, %v65_v32, 0.0  ;;  %v66_v37 = vsel %vm63_vm1, %v64_v30, %v65_v32  ;;  %vm306_vm8 = vcmask 123904  }
  0x1e   :  { %86 = vrot.lane.b32.xlu1 %v76_v36, %s428_s0  ;;  %v68_v38 = vrot.slane %v58_v33, 7  ;;  %v75_v39 = vsel %vm63_vm1, 0.0, %v67_v35  ;;  %p382_p11 = por %p381_p10, %p380_p9 }
  0x20   :  { %v69_v40 = vsel %vm63_vm1, %v67_v35, %v68_v38  ;;  %v77_v41 = vsel %vm63_vm1, %v68_v38, 0.0  ;;  %p383_p12 = pnand %p382_p11, %p376_p8 }
  0x21   :  { %84 = vrot.lane.b32.xlu0 %v66_v37, %s428_s0 }
  0x22   :  { %88 = vrot.lane.b32.xlu1 %v75_v39, %s428_s0 }
  0x25   :  { %90 = vrot.lane.b32.xlu0 %v69_v40, %s428_s0 }
  0x26   :  { %92 = vrot.lane.b32.xlu1 %v77_v41, %s428_s0 }
  0x8f   :  { %v83_v42 = vpop.permute.xlu0 %82 }
  0x90   :  { %v101_v43 = vsel %vm100_vm2, 0.0, %v83_v42  ;;  %v87_v44 = vpop.permute.xlu1 %86 }
  0x91   :  { %v484_v45 = vsel %vm107_vm3, %v101_v43, 0.0  ;;  %v103_v46 = vsel %vm100_vm2, 0.0, %v87_v44 }
  0x92   :  { %180 = vrot.lane.b32.xlu0 %v484_v45, %s429_s23  ;;  %v489_v47 = vsel %vm107_vm3, %v103_v46, 0.0  ;;  %v114_v60 = vmul.f32 2.0, %v484_v45 }
  0x93   :  { %v85_v48 = vpop.permute.xlu0 %84  ;;  %v116_v63 = vmul.f32 2.0, %v489_v47 }
  0x94   :  { %v102_v49 = vsel %vm100_vm2, 0.0, %v85_v48  ;;  %v89_v50 = vpop.permute.xlu1 %88 }
  0x95   :  { %v493_v51 = vsel %vm107_vm3, %v102_v49, 0.0  ;;  %v104_v52 = vsel %vm100_vm2, 0.0, %v89_v50 }
  0x96   :  { %184 = vrot.lane.b32.xlu0 %v489_v47, %s429_s23  ;;  %182 = vrot.lane.b32.xlu1 %v493_v51, %s429_s23  ;;  %v499_v53 = vsel %vm107_vm3, %v104_v52, 0.0  ;;  %v115_v61 = vmul.f32 2.0, %v493_v51 }
  0x97   :  { %v91_v54 = vpop.permute.xlu0 %90  ;;  %v117_v62 = vmul.f32 2.0, %v499_v53 }
  0x98   :  { %v105_v55 = vsel %vm100_vm2, 0.0, %v91_v54  ;;  %v93_v56 = vpop.permute.xlu1 %92 }
  0x99   :  { %v503_v57 = vsel %vm107_vm3, %v105_v55, 0.0  ;;  %v106_v58 = vsel %vm100_vm2, 0.0, %v93_v56 }
  0x9a   :  { %186 = vrot.lane.b32.xlu1 %v499_v53, %s429_s23  ;;  %188 = vrot.lane.b32.xlu0 %v503_v57, %s429_s23  ;;  %v509_v59 = vsel %vm107_vm3, %v106_v58, 0.0  ;;  %v118_v0 = vmul.f32 2.0, %v503_v57 }
  0x9b   :  { %v119_v1 = vmul.f32 2.0, %v509_v59 }
  0x9e   :  { %190 = vrot.lane.b32.xlu1 %v509_v59, %s429_s23  ;;  %156 = vrot.lane.b32.xlu0 %v484_v45, %s430_s24 }
  0xa2   :  { %158 = vrot.lane.b32.xlu1 %v493_v51, %s430_s24  ;;  %162 = vrot.lane.b32.xlu0 %v499_v53, %s430_s24 }
  0xa6   :  { %164 = vrot.lane.b32.xlu1 %v503_v57, %s430_s24  ;;  %160 = vrot.lane.b32.xlu0 %v489_v47, %s430_s24 }
  0xaa   :  { %166 = vrot.lane.b32.xlu1 %v509_v59, %s430_s24  ;;  %126 = vrot.lane.b32.xlu0 %v114_v60, %s431_s25 }
  0xae   :  { %128 = vrot.lane.b32.xlu1 %v115_v61, %s431_s25  ;;  %132 = vrot.lane.b32.xlu0 %v117_v62, %s431_s25 }
  0xb2   :  { %130 = vrot.lane.b32.xlu0 %v116_v63, %s431_s25  ;;  %134 = vrot.lane.b32.xlu1 %v118_v0, %s431_s25 }
  0xb6   :  { %136 = vrot.lane.b32.xlu1 %v119_v1, %s431_s25 }
 0x104   :  { %v181_v2 = vpop.permute.xlu0 %180 }
 0x105   :  { %v198_v3 = vsub.f32 %v484_v45, %v181_v2 }
 0x107   :  { %v204_v8 = vmul.f32 2.0, %v198_v3  ;;  %v242_v19 = vrot.slane %v198_v3, 2 }
 0x108   :  { %v183_v4 = vpop.permute.xlu1 %182  ;;  %v185_v5 = vpop.permute.xlu0 %184 }
 0x109   :  { %v199_v6 = vsub.f32 %v493_v51, %v183_v4  ;;  %v200_v7 = vsub.f32 %v489_v47, %v185_v5  ;;  %v217_v17 = vrot.slane %v204_v8, 1 }
 0x10b   :  { %v205_v9 = vmul.f32 2.0, %v199_v6  ;;  %v206_v10 = vmul.f32 2.0, %v200_v7  ;;  %v243_v18 = vrot.slane %v199_v6, 2  ;;  %v245_v20 = vrot.slane %v200_v7, 2 }
 0x10c   :  { %v187_v11 = vpop.permute.xlu1 %186  ;;  %v189_v12 = vpop.permute.xlu0 %188 }
 0x10d   :  { %v218_v13 = vrot.slane %v205_v9, 1  ;;  %v220_v14 = vrot.slane %v206_v10, 1  ;;  %v201_v15 = vsub.f32 %v499_v53, %v187_v11  ;;  %v202_v16 = vsub.f32 %v503_v57, %v189_v12 }
 0x10e   :  { %v244_v33 = vsel %vm241_vm5, %v242_v19, %v243_v18  ;;  %v246_v37 = vsel %vm241_vm5, %v243_v18, %v245_v20 }
 0x10f   :  { %v207_v21 = vmul.f32 2.0, %v201_v15  ;;  %v208_v22 = vmul.f32 2.0, %v202_v16  ;;  %v247_v23 = vrot.slane %v201_v15, 2  ;;  %v248_v24 = vrot.slane %v202_v16, 2 }
 0x110   :  { %v191_v25 = vpop.permute.xlu1 %190  ;;  %v157_v26 = vpop.permute.xlu0 %156  ;;  %v219_v27 = vsel %vm216_vm4, %v217_v17, %v218_v13  ;;  %v221_v28 = vsel %vm216_vm4, %v218_v13, %v220_v14 }
 0x111   :  { %v222_v29 = vrot.slane %v207_v21, 1  ;;  %v223_v30 = vrot.slane %v208_v22, 1  ;;  %v203_v31 = vsub.f32 %v509_v59, %v191_v25  ;;  %v231_v32 = vadd.f32 %v219_v27, %v198_v3 }
 0x112   :  { %v232_v34 = vadd.f32 %v221_v28, %v199_v6  ;;  %v249_v46 = vsel %vm241_vm5, %v247_v23, %v248_v24 }
 0x113   :  { %v209_v35 = vmul.f32 2.0, %v203_v31  ;;  %v256_v36 = vadd.f32 %v244_v33, %v231_v32  ;;  %v224_v38 = vsel %vm216_vm4, %v222_v29, %v223_v30  ;;  %v250_v44 = vrot.slane %v203_v31, 2 }
 0x114   :  { %v159_v39 = vpop.permute.xlu1 %158  ;;  %v257_v40 = vadd.f32 %v246_v37, %v232_v34  ;;  %v163_v41 = vpop.permute.xlu0 %162  ;;  %v233_v42 = vadd.f32 %v224_v38, %v201_v15 }
 0x115   :  { %v225_v43 = vrot.slane %v209_v35, 1  ;;  %287 = vrot.lane.b32.xlu0 %v256_v36, %s430_s24  ;;  %v251_v55 = vsel %vm241_vm5, %v248_v24, %v250_v44 }
 0x116   :  { %289 = vrot.lane.b32.xlu1 %v257_v40, %s430_s24  ;;  %v258_v48 = vadd.f32 %v249_v46, %v233_v42 }
 0x117   :  { %v226_v49 = vsel %vm216_vm4, %v223_v30, %v225_v43 }
 0x118   :  { %v165_v50 = vpop.permute.xlu1 %164  ;;  %v161_v52 = vpop.permute.xlu0 %160  ;;  %v234_v54 = vadd.f32 %v226_v49, %v202_v16 }
 0x119   :  { %291 = vrot.lane.b32.xlu0 %v258_v48, %s430_s24 }
 0x11a   :  { %v259_v56 = vadd.f32 %v251_v55, %v234_v54 }
 0x11c   :  { %v167_v58 = vpop.permute.xlu1 %166  ;;  %293 = vrot.lane.b32.xlu1 %v259_v56, %s430_s24  ;;  %v127_v60 = vpop.permute.xlu0 %126 }
 0x11d   :  { %v144_v61 = vadd.f32 %v127_v60, %v484_v45 }
 0x11f   :  { %v174_v62 = vadd.f32 %v157_v26, %v144_v61 }
 0x120   :  { %v129_v63 = vpop.permute.xlu1 %128  ;;  %v133_v0 = vpop.permute.xlu0 %132 }
 0x121   :  { %v265_v1 = vrot.slane %v174_v62, 6  ;;  %v145_v2 = vadd.f32 %v129_v63, %v493_v51  ;;  %v147_v3 = vadd.f32 %v133_v0, %v499_v53 }
 0x123   :  { %v277_v4 = vsub.f32 %v174_v62, %v265_v1  ;;  %v175_v5 = vadd.f32 %v159_v39, %v145_v2  ;;  %v177_v6 = vadd.f32 %v163_v41, %v147_v3 }
 0x124   :  { %v135_v7 = vpop.permute.xlu1 %134  ;;  %v131_v8 = vpop.permute.xlu0 %130 }
 0x125   :  { %304 = vst.msk [vmem:[#allocation6 - $0x2] sm:$0xfc] %vm303_vm6, %v277_v4  ;;  %v266_v9 = vrot.slane %v175_v5, 6  ;;  %v268_v10 = vrot.slane %v177_v6, 6  ;;  %v148_v45 = vadd.f32 %v135_v7, %v503_v57  ;;  %v146_v11 = vadd.f32 %v131_v8, %v489_v47 }
 0x127   :  { %v267_v12 = vsel %vm264_vm7, %v265_v1, %v266_v9  ;;  %v280_v51 = vsub.f32 %v177_v6, %v268_v10  ;;  %v178_v13 = vadd.f32 %v165_v50, %v148_v45  ;;  %v176_v53 = vadd.f32 %v161_v52, %v146_v11 }
 0x128   :  { %v278_v14 = vsub.f32 %v175_v5, %v267_v12  ;;  %v137_v15 = vpop.permute.xlu1 %136 }
 0x129   :  { %308 = vst.msk [vmem:[#allocation6 + $0xe] sm:$0xfc] %vm303_vm6, %v280_v51  ;;  %v269_v16 = vrot.slane %v178_v13, 6  ;;  %v279_v17 = vsub.f32 %v176_v53, %v266_v9  ;;  %v149_v18 = vadd.f32 %v137_v15, %v509_v59 }
 0x12a   :  { %305 = vst.msk [vmem:[#allocation6 + $0x6] sm:$0xff] %vm38_vm0, %v278_v14 }
 0x12b   :  { %v270_v47 = vsel %vm264_vm7, %v268_v10, %v269_v16  ;;  %307 = vst.msk [vmem:[#allocation6 + $0xe] sm:$0x3] %vm306_vm8, %v279_v17  ;;  %v179_v57 = vadd.f32 %v167_v58, %v149_v18 }
 0x12c   :  { %v281_v19 = vsub.f32 %v178_v13, %v270_v47 }
 0x12d   :  { %v282_v20 = vsub.f32 %v179_v57, %v269_v16 }
 0x12e   :  { %309 = vst.msk [vmem:[#allocation6 + $0x16] sm:$0xff] %vm38_vm0, %v281_v19 }
 0x12f   :  { %310 = vst.msk [vmem:[#allocation6 + $0x1e] sm:$0x3] %vm306_vm8, %v282_v20 }
 0x130   :  { %386 = shalt.err (!%p383_p12)
}
 0x131   :  { %s387_s3 = scalar_lea.hbm %s598_s2, 512 }
 0x132   :  { %p388_p13 = scmp.ne.s32.totalorder %s598_s2, %s387_s3  ;;  %p391_p0 = scmp.lt.u32.totalorder %s387_s3, %s598_s2 }
 0x134   :  { %p393_p1 = pnand %p391_p0, %p388_p13 }
 0x136   :  { %396 = shalt.err (!%p393_p1)
}
 0x137   :  { %334 = dma.vmem_to_hbm [thread:$0]  %s329_s27, 512, %s598_s2, [#allocation7], %s426_s19, %s426_s19, %s427_s20  }
 0x138   :  { %s433_s10 = smov [#allocation5]  }
 0x139   :  { %s316_s11 = sshll.u32 %s433_s10, 4  ;;  %s317_s11 = int_to_ptr.vmem [resolvable:$true] %s316_s11 }
 0x13a   :  { %s397_s12 = scalar_lea.vmem %s317_s11, 512  ;;  %p402_p3 = scmp.lt.s32.totalorder %s317_s11, %s317_s11 }
 0x13b   :  { %p398_p2 = scmp.ne.s32.totalorder %s317_s11, %s397_s12  ;;  %p403_p4 = scmp.lt.s32.totalorder %s397_s12, %s397_s12 }
 0x13d   :  { %p404_p5 = por %p403_p4, %p402_p3 }
 0x13f   :  { %p405_p6 = pnand %p404_p5, %p398_p2 }
 0x187   :  { %v288_v59 = vpop.permute.xlu0 %287 }
 0x188   :  { %v290_v21 = vpop.permute.xlu1 %289  ;;  %299 = vst.msk [vmem:[#allocation5] sm:$0xff] %vm38_vm0, %v288_v59 }
 0x189   :  { %300 = vst.msk [vmem:[#allocation5 + $0x8] sm:$0xff] %vm38_vm0, %v290_v21 }
 0x18b   :  { %v292_v22 = vpop.permute.xlu0 %291 }
 0x18c   :  { %301 = vst.msk [vmem:[#allocation5 + $0x10] sm:$0xff] %vm38_vm0, %v292_v22 }
 0x18e   :  { %v294_v23 = vpop.permute.xlu1 %293 }
 0x18f   :  { %302 = vst.msk [vmem:[#allocation5 + $0x18] sm:$0xff] %vm38_vm0, %v294_v23 }
 0x190   :  { %408 = shalt.err (!%p405_p6)
}
 0x191   :  { %s409_s14 = scalar_lea.hbm %s597_s1, 512 }
 0x192   :  { %p410_p7 = scmp.ne.s32.totalorder %s597_s1, %s409_s14  ;;  %p413_p8 = scmp.lt.u32.totalorder %s409_s14, %s597_s1 }
 0x194   :  { %p415_p9 = pnand %p413_p8, %p410_p7 }
 0x196   :  { %418 = shalt.err (!%p415_p9)
}
 0x197   :  { %322 = dma.vmem_to_hbm [thread:$0]  %s317_s11, 512, %s597_s1, [#allocation4], %s426_s19, %s426_s19, %s427_s20  }
 0x198   :  { %421 = dma.done.wait [#allocation4], 512  }
 0x199   :  { %422 = vsyncadd [#allocation4], 4294966784 }
 0x19a   :  { %423 = dma.done.wait [#allocation7], 512  }
 0x19b   :  { %424 = vsyncadd [#allocation7], 4294966784 }
 0x19c   :  { %341 = vsyncpa [#allocation3], 1 }
 0x19d   :  { %342 = vsyncpa [#allocation4], 1 }
 0x19e   :  { %343 = vsyncpa [#allocation7], 1 }

</bundles_post_ra>
